<compile_context>
chip_gen: v5e
topology: v5e:2x2
jax: 0.10.0
libtpu: 0.0.40
codegen_flags: <defaults>
</compile_context>

<pallas_src>
import functools

import jax
import jax.numpy as jnp
from jax.experimental import pallas as pl
from jax.experimental.pallas import tpu as pltpu


_MAX_TILE_N = 4096  # row cap (sublane axis)


def _mem_budget():
    """(bytes per f32 input block, vmem_limit_bytes), sized from physical VMEM."""
    vmem = None
    try:
        vmem = getattr(pltpu.get_tpu_info(), "vmem_capacity_bytes", None)
    except Exception:
        vmem = None
    if vmem is None:
        vmem = 64 * 1024 * 1024
    if vmem <= 64 * 1024 * 1024:
        # v7x-class: 64 MiB / TensorCore -> 2 inputs x 2 buffers x 8 MiB = 32 MiB
        return 8 * 1024 * 1024, 48 * 1024 * 1024
    # v5e / v6e: 128 MiB physical -> 2 x 2 x 12 MiB = 48 MiB, limit 96 MiB
    return 12 * 1024 * 1024, 96 * 1024 * 1024


def _pick_tile(dim, unit, cap):
    """Largest t <= cap with dim % t == 0 and t % unit == 0; full dim if it fits."""
    if dim <= cap:
        return dim
    t = (cap // unit) * unit
    while t >= unit:
        if dim % t == 0:
            return t
        t -= unit
    return dim  # unreachable when dim % unit == 0 (asserted by the caller)


def _focal_elementwise(p, t, alpha, gamma, hard_targets):
    """Per-element focal loss (float32)."""
    p = p.astype(jnp.float32)
    t = t.astype(jnp.float32)
    if hard_targets:
        # Exact for {0,1} targets: pt = p when t==1 else 1-p; bce = -clamp(log(pt)).
        # One log per element (vs 2 logs + 1 exp on the exact-parity path).
        pt = t * p + (1.0 - t) * (1.0 - p)
        bce = -jnp.maximum(jnp.log(pt), -100.0)
    else:
        # PyTorch binary_cross_entropy on probabilities (log clamped at -100).
        log_p = jnp.maximum(jnp.log(p), -100.0)
        log_1mp = jnp.maximum(jnp.log(1.0 - p), -100.0)
        bce = -(t * log_p + (1.0 - t) * log_1mp)
        pt = jnp.exp(-bce)
    # alpha*t + (1-alpha)*(1-t) folded to one FMA; constant when alpha == 0.5.
    if alpha == 0.5:
        a = jnp.float32(0.5)
    else:
        a = (1.0 - alpha) + (2.0 * alpha - 1.0) * t
    q = 1.0 - pt
    if gamma == 2:
        mod = q * q                       # never lowers to the exp/log pow path
    elif float(gamma) == int(gamma) and int(gamma) >= 0:
        mod = q ** int(gamma)             # integer pow -> repeated multiplies
    else:
        # TODO(synk): fractional gamma hits the pow -> exp/log lowering.
        mod = jnp.maximum(q, 0.0) ** gamma
    return a * mod * bce


def _focal_reduce_kernel(p_ref, t_ref, out_ref, acc_ref, *, alpha, gamma, hard_targets):
    i = pl.program_id(1)   # row tile within this split   (reduction axis)
    j = pl.program_id(2)   # column tile                  (reduction axis)
    ni = pl.num_programs(1)
    nj = pl.num_programs(2)

    @pl.when(jnp.logical_and(i == 0, j == 0))
    def _():
        acc_ref[...] = jnp.zeros_like(acc_ref)

    f = _focal_elementwise(p_ref[...], t_ref[...], alpha, gamma, hard_targets)
    # Per-step sublane-group partial: (tile_n, tile_c) -> (8, tile_c).
    # Pure VALU adds; the acc vld/vst now touch a single vreg row of blocks.
    acc_ref[...] += jnp.sum(f.reshape(f.shape[0] // 8, 8, f.shape[1]), axis=0)

    @pl.when(jnp.logical_and(i == ni - 1, j == nj - 1))
    def _():
        out_ref[...] = acc_ref[...]


def _focal_elem_kernel(p_ref, t_ref, out_ref, *, alpha, gamma, hard_targets):
    out_ref[...] = _focal_elementwise(
        p_ref[...], t_ref[...], alpha, gamma, hard_targets).astype(out_ref.dtype)


def focal_loss(inputs, targets, *, alpha=0.5, gamma=2, reduce=True,
               hard_targets=False, out_dtype=jnp.float32):
    """FocalLoss forward.  inputs: dict with 'multilabel_proba' of shape (N, C).

    hard_targets=True assumes binary {0,1} targets: pt/bce are computed
    algebraically (1 log per element instead of 2 logs + 1 exp) and targets
    travel as bf16.  The default path matches PyTorch's exp(-bce) formulation.
    """
    # TODO(synk): logits=True path (binary_cross_entropy_with_logits) not wired; module default is logits=False.
    p = inputs["multilabel_proba"]
    n, c = p.shape
    assert n % 8 == 0 and c % 128 == 0, "expects sublane/lane aligned (N % 8, C % 128)"
    # TODO(synk): general N/C would need a padded/masked path.

    block_bytes, vmem_limit = _mem_budget()

    # Sub-32-bit operands (bf16 targets / narrow output) need tile_n % 16 == 0.
    wants_sub32 = hard_targets or (not reduce and jnp.dtype(out_dtype).itemsize < 4)
    row_unit = 16 if (wants_sub32 and n % 16 == 0) else 8

    # --- tile selection: prefer full-width contiguous blocks, shrink rows ---
    if c * 4 * row_unit <= block_bytes:
        tile_c = c
    else:
        col_cap = max(128, (block_bytes // (4 * row_unit)) // 128 * 128)
        tile_c = _pick_tile(c, 128, col_cap)
    row_cap = max(row_unit,
                  min(_MAX_TILE_N, (block_bytes // (tile_c * 4)) // row_unit * row_unit))
    tile_n = _pick_tile(n, row_unit, row_cap)
    row_tiles = n // tile_n
    col_tiles = c // tile_c

    t_dtype = jnp.bfloat16 if (hard_targets and tile_n % 16 == 0) else jnp.float32
    t = targets.astype(t_dtype)

    if reduce:
        # Give both v7x TensorCores work: if both tile counts are odd, re-tile
        # rows so the row-tile count becomes even (harmless on v5e/v6e).
        if row_tiles % 2 == 1 and col_tiles % 2 == 1:
            half = tile_n // 2
            if half >= row_unit and half % row_unit == 0 and n % half == 0:
                tile_n = half
                row_tiles = n // tile_n

        if row_tiles % 2 == 0:
            num_splits, split_rows = 2, True
        elif col_tiles % 2 == 0:
            num_splits, split_rows = 2, False
        else:
            num_splits, split_rows = 1, True

        if split_rows:
            tps = row_tiles // num_splits
            grid = (num_splits, tps, col_tiles)
            in_map = lambda s, i, j: (s * tps + i, j)
        else:
            cps = col_tiles // num_splits
            grid = (num_splits, row_tiles, cps)
            in_map = lambda s, i, j: (i, s * cps + j)

        kern = functools.partial(
            _focal_reduce_kernel, alpha=alpha, gamma=gamma, hard_targets=hard_targets)
        partials = pl.pallas_call(
            kern,
            out_shape=jax.ShapeDtypeStruct((num_splits * 8, tile_c), jnp.float32),
            grid_spec=pltpu.PrefetchScalarGridSpec(
                num_scalar_prefetch=0,
                grid=grid,
                in_specs=[
                    pl.BlockSpec((tile_n, tile_c), in_map),
                    pl.BlockSpec((tile_n, tile_c), in_map),
                ],
                out_specs=pl.BlockSpec((8, tile_c), lambda s, i, j: (s, 0)),
                scratch_shapes=[pltpu.VMEM((8, tile_c), jnp.float32)],
            ),
            compiler_params=pltpu.CompilerParams(
                dimension_semantics=("parallel", "arbitrary", "arbitrary"),
                vmem_limit_bytes=vmem_limit,
            ),
        )(p, t)
        return jnp.sum(partials) / float(n * c)

    else:
        kern = functools.partial(
            _focal_elem_kernel, alpha=alpha, gamma=gamma, hard_targets=hard_targets)
        return pl.pallas_call(
            kern,
            out_shape=jax.ShapeDtypeStruct((n, c), out_dtype),
            grid_spec=pltpu.PrefetchScalarGridSpec(
                num_scalar_prefetch=0,
                grid=(row_tiles, col_tiles),
                in_specs=[
                    pl.BlockSpec((tile_n, tile_c), lambda i, j: (i, j)),
                    pl.BlockSpec((tile_n, tile_c), lambda i, j: (i, j)),
                ],
                out_specs=pl.BlockSpec((tile_n, tile_c), lambda i, j: (i, j)),
            ),
            compiler_params=pltpu.CompilerParams(
                dimension_semantics=("parallel", "parallel"),
                vmem_limit_bytes=vmem_limit,
            ),
        )(p, t)


def _reference_focal_elem(p, t, alpha=0.5, gamma=2):
    log_p = jnp.maximum(jnp.log(p), -100.0)
    log_1mp = jnp.maximum(jnp.log(1.0 - p), -100.0)
    bce = -(t * log_p + (1.0 - t) * log_1mp)
    pt = jnp.exp(-bce)
    a = alpha * t + (1.0 - alpha) * (1.0 - t)
    return a * (1.0 - pt) ** gamma * bce


def _reference_focal_mean(p, t, alpha=0.5, gamma=2):
    return jnp.mean(_reference_focal_elem(p, t, alpha, gamma))


if __name__ == "__main__":
    key = jax.random.PRNGKey(0)
    k1, k2 = jax.random.split(key)

    N, C = 16, 128  # batch=16, num_labels=128 (small demo shapes)
    probs = jax.nn.sigmoid(jax.random.normal(k1, (N, C), dtype=jnp.float32))
    targets = (jax.random.uniform(k2, (N, C)) > 0.5).astype(jnp.float32)
    inputs = {"multilabel_proba": probs}

    # reduce=True, exact-parity path (2 logs + exp(-bce))
    out = focal_loss(inputs, targets, alpha=0.5, gamma=2, reduce=True)
    out = jax.block_until_ready(out)
    ref = _reference_focal_mean(probs, targets)
    assert jnp.allclose(out, ref, rtol=1e-5, atol=1e-6), (out, ref)

    # reduce=True, fast path for binary targets (bf16 targets, single log)
    out_fast = focal_loss(inputs, targets, alpha=0.5, gamma=2, reduce=True,
                          hard_targets=True)
    out_fast = jax.block_until_ready(out_fast)
    assert jnp.allclose(out_fast, ref, rtol=1e-4, atol=1e-6), (out_fast, ref)

    # reduce=False elementwise path (f32 output = PyTorch parity)
    out_elem = focal_loss(inputs, targets, alpha=0.5, gamma=2, reduce=False)
    out_elem = jax.block_until_ready(out_elem)
    ref_elem = _reference_focal_elem(probs, targets)
    assert jnp.allclose(out_elem, ref_elem, rtol=1e-5, atol=1e-6)

    print("KERNEL_OK")
</pallas_src>

<mosaic_0001>
module attributes {stable_mosaic.version = 11 : i64} {
  func.func @_focal_reduce_kernel(%arg0: i32, %arg1: i32, %arg2: i32, %arg3: memref<8x128xf32, #tpu.memory_space<vmem>>, %arg4: memref<8x128xf32, #tpu.memory_space<vmem>>, %arg5: memref<8x128xf32, #tpu.memory_space<vmem>>, %arg6: memref<8x128xf32, #tpu.memory_space<vmem>>) attributes {dimension_semantics = [#tpu.dimension_semantics<parallel>, #tpu.dimension_semantics<arbitrary>, #tpu.dimension_semantics<arbitrary>], iteration_bounds = array<i64: 2, 1, 1>, scalar_prefetch = 0 : i64, scratch_operands = 1 : i64, tpu.core_type = #tpu.core_type<tc>, window_params = [{transform_indices = @transform_0, window_bounds = array<i64: 8, 128>}, {transform_indices = @transform_1, window_bounds = array<i64: 8, 128>}, {transform_indices = @transform_2, window_bounds = array<i64: 8, 128>}]} {
    %c0_i32 = arith.constant 0 : i32
    %0 = arith.cmpi eq, %arg1, %c0_i32 : i32
    %c0_i32_0 = arith.constant 0 : i32
    %1 = arith.cmpi eq, %arg2, %c0_i32_0 : i32
    %2 = arith.andi %0, %1 : i1
    %3 = arith.extui %2 : i1 to i32
    %c0_i32_1 = arith.constant 0 : i32
    %4 = arith.cmpi ne, %3, %c0_i32_1 : i32
    scf.if %4 {
      %cst_20 = arith.constant 0.000000e+00 : f32
      %41 = vector.broadcast %cst_20 : f32 to vector<8x128xf32>
      %c0_21 = arith.constant 0 : index
      %c0_22 = arith.constant 0 : index
      %42 = vector.load %arg6[%c0_21, %c0_22] : memref<8x128xf32, #tpu.memory_space<vmem>>, vector<8x128xf32>
      tpu.vector_store %arg6[%c0_21, %c0_22], %41 {strides = array<i32>} : memref<8x128xf32, #tpu.memory_space<vmem>>, vector<8x128xf32>,
    } else {
    }
    %c0 = arith.constant 0 : index
    %c0_2 = arith.constant 0 : index
    %5 = vector.load %arg3[%c0, %c0_2] : memref<8x128xf32, #tpu.memory_space<vmem>>, vector<8x128xf32>
    %c0_3 = arith.constant 0 : index
    %c0_4 = arith.constant 0 : index
    %6 = vector.load %arg4[%c0_3, %c0_4] : memref<8x128xf32, #tpu.memory_space<vmem>>, vector<8x128xf32>
    %7 = math.log %5 : vector<8x128xf32>
    %cst = arith.constant -1.000000e+02 : f32
    %8 = vector.broadcast %cst : f32 to vector<8x128xf32>
    %9 = arith.maximumf %7, %8 : vector<8x128xf32>
    %cst_5 = arith.constant 1.000000e+00 : f32
    %10 = vector.broadcast %cst_5 : f32 to vector<8x128xf32>
    %11 = arith.subf %10, %5 : vector<8x128xf32>
    %12 = math.log %11 : vector<8x128xf32>
    %cst_6 = arith.constant -1.000000e+02 : f32
    %13 = vector.broadcast %cst_6 : f32 to vector<8x128xf32>
    %14 = arith.maximumf %12, %13 : vector<8x128xf32>
    %15 = arith.mulf %6, %9 : vector<8x128xf32>
    %cst_7 = arith.constant 1.000000e+00 : f32
    %16 = vector.broadcast %cst_7 : f32 to vector<8x128xf32>
    %17 = arith.subf %16, %6 : vector<8x128xf32>
    %18 = arith.mulf %17, %14 : vector<8x128xf32>
    %19 = arith.addf %15, %18 : vector<8x128xf32>
    %cst_8 = arith.constant 0.000000e+00 : f32
    %20 = vector.broadcast %cst_8 : f32 to vector<8x128xf32>
    %21 = arith.subf %20, %19 : vector<8x128xf32>
    %cst_9 = arith.constant 0.000000e+00 : f32
    %22 = vector.broadcast %cst_9 : f32 to vector<8x128xf32>
    %23 = arith.subf %22, %21 : vector<8x128xf32>
    %24 = math.exp %23 : vector<8x128xf32>
    %cst_10 = arith.constant 1.000000e+00 : f32
    %25 = vector.broadcast %cst_10 : f32 to vector<8x128xf32>
    %26 = arith.subf %25, %24 : vector<8x128xf32>
    %27 = arith.mulf %26, %26 : vector<8x128xf32>
    %cst_11 = arith.constant 5.000000e-01 : f32
    %28 = vector.broadcast %cst_11 : f32 to vector<8x128xf32>
    %29 = arith.mulf %28, %27 : vector<8x128xf32>
    %30 = arith.mulf %29, %21 : vector<8x128xf32>
    %c0_12 = arith.constant 0 : index
    %c0_13 = arith.constant 0 : index
    %31 = vector.load %arg6[%c0_12, %c0_13] : memref<8x128xf32, #tpu.memory_space<vmem>>, vector<8x128xf32>
    %32 = vector.shape_cast %30 : vector<8x128xf32> to vector<1x8x128xf32>
    %cst_14 = arith.constant dense<0.000000e+00> : vector<8x128xf32>
    %33 = vector.multi_reduction <add>, %32, %cst_14 [0] : vector<1x8x128xf32> to vector<8x128xf32>
    %34 = arith.addf %31, %33 : vector<8x128xf32>
    %c0_15 = arith.constant 0 : index
    %c0_16 = arith.constant 0 : index
    %35 = vector.load %arg6[%c0_15, %c0_16] : memref<8x128xf32, #tpu.memory_space<vmem>>, vector<8x128xf32>
    tpu.vector_store %arg6[%c0_15, %c0_16], %34 {strides = array<i32>} : memref<8x128xf32, #tpu.memory_space<vmem>>, vector<8x128xf32>,
    %c0_i32_17 = arith.constant 0 : i32
    %36 = arith.cmpi eq, %arg1, %c0_i32_17 : i32
    %c0_i32_18 = arith.constant 0 : i32
    %37 = arith.cmpi eq, %arg2, %c0_i32_18 : i32
    %38 = arith.andi %36, %37 : i1
    %39 = arith.extui %38 : i1 to i32
    %c0_i32_19 = arith.constant 0 : i32
    %40 = arith.cmpi ne, %39, %c0_i32_19 : i32
    scf.if %40 {
      %c0_20 = arith.constant 0 : index
      %c0_21 = arith.constant 0 : index
      %41 = vector.load %arg6[%c0_20, %c0_21] : memref<8x128xf32, #tpu.memory_space<vmem>>, vector<8x128xf32>
      %c0_22 = arith.constant 0 : index
      %c0_23 = arith.constant 0 : index
      %42 = vector.load %arg5[%c0_22, %c0_23] : memref<8x128xf32, #tpu.memory_space<vmem>>, vector<8x128xf32>
      tpu.vector_store %arg5[%c0_22, %c0_23], %41 {strides = array<i32>} : memref<8x128xf32, #tpu.memory_space<vmem>>, vector<8x128xf32>,
    } else {
    }
    return
  }
  func.func @transform_0(%arg0: i32, %arg1: i32, %arg2: i32) -> (i32, i32) {
    %c1_i32 = arith.constant 1 : i32
    %0 = arith.muli %arg0, %c1_i32 : i32
    %1 = arith.addi %0, %arg1 : i32
    %c0_i32 = arith.constant 0 : i32
    return %1, %arg2 : i32, i32
  }
  func.func @transform_1(%arg0: i32, %arg1: i32, %arg2: i32) -> (i32, i32) {
    %c1_i32 = arith.constant 1 : i32
    %0 = arith.muli %arg0, %c1_i32 : i32
    %1 = arith.addi %0, %arg1 : i32
    %c0_i32 = arith.constant 0 : i32
    return %1, %arg2 : i32, i32
  }
  func.func @transform_2(%arg0: i32, %arg1: i32, %arg2: i32) -> (i32, i32) {
    %c0_i32 = arith.constant 0 : i32
    %c0_i32_0 = arith.constant 0 : i32
    return %arg0, %c0_i32 : i32, i32
  }
}

</mosaic_0001>

<bundles_post_ra>
// kernel: tpu_custom_call.1
= control target key start
LH: loop header
LB: loop body
LE: loop exit
PB: predicated region body
PF: predicated region fallthrough
CT: control target
= control target key end

     0   :  { %7 = vsyncpa [#allocation4], 0  ;;  %s778_s0 = inlined_call_operand.hbm [shape: f32[16,128], index: 0, kind: input, shape index: {}]   ;;  %s779_s1 = inlined_call_operand.hbm [shape: f32[16,128], index: 1, kind: input, shape index: {}]   ;;  %s780_s2 = inlined_call_operand.hbm [shape: f32[16,128], index: 2, kind: output, shape index: {}]  }
   0x1   :  { %9 = vsyncpa [#allocation4 + $0x1], 0 }
   0x2   :  { %10 = vsyncpa [#allocation7], 0 }
   0x3   :  { %12 = vsyncpa [#allocation7 + $0x1], 0 }
   0x4   :  { %13 = vsyncpa [#allocation5], 0 }
   0x5   :  { %15 = vsyncpa [#allocation5 + $0x1], 0  ;;  %s645_s9 = smov 0   ;;  %s647_s10 = smov 0  }
   0x6   :  { %s649_s11 = smov 0   ;;  %s651_s12 = smov 0  }
   0x7   :  { %s653_s13 = smov 0   ;;  %s655_s14 = smov 0  }
   0x8 LB: > { %s393_s15 = sadd.s32 4294967295, %s628_s14   ;;  %s394_s16 = sadd.s32 4294967294, %s628_s14   ;;  %s628_s14 = sphi %s655_s14, %s21_s14   ;;  %s624_s13 = sphi %s653_s13, %s789_s13   ;;  %s620_s12 = sphi %s651_s12, %s788_s12   ;;  %s616_s11 = sphi %s649_s11, %s787_s11   ;;  %s612_s10 = sphi %s647_s10, %s786_s10   ;;  %s608_s9 = sphi %s645_s9, %s785_s9  }
   0x9   : > { %s40_s17 = sadd.s32 1, %s624_s13  ;;  %s51_s18 = sadd.s32 1, %s616_s11 }
   0xa   : > { %p42_p0 = scmp.ge.s32.totalorder %s40_s17, 2  ;;  %p58_p1 = scmp.ne.s32.totalorder %s616_s11, %s612_s10 }
   0xb   : > { %p59_p2 = scmp.eq.s32.totalorder %s628_s14, 0  ;;  %p64_p3 = scmp.ne.s32.totalorder %s612_s10, %s608_s9 }
   0xc   : > { %s791_s17 = smov (%p42_p0, %s40_s17), 0  ;;  %p65_p5 = scmp.eq.s32.totalorder %s393_s15, 0 }
   0xd   : > { %p686_p4 = por %p59_p2, %p58_p1  ;;  %s46_s20 = ssub.s32 %s624_s13, %s791_s17 }
   0xe   : > { %p118_p6 = scmp.eq.s32.totalorder %s393_s15, 1  ;;  %p49_p7 = scmp.eq.s32.totalorder %s46_s20, 0 }
   0xf   : > { %p692_p8 = por %p65_p5, %p64_p3  ;;  %p124_p10 = scmp.eq.s32.totalorder %s394_s16, 1 }
  0x10   : > { %p696_p9 = por %p118_p6, %p58_p1  ;;  %p396_p12 = scmp.ge.s32.totalorder %s628_s14, 2 }
  0x11   : > { %s701_s23 = scalar_select %p49_p7, %s616_s11, %s51_s18  }
  0x12   : > { %p703_p11 = por %p124_p10, %p64_p3  ;;  %p426_p13 = scmp.lt.s32.totalorder %s628_s14, 2 }
  0x13   : > { %s144_s25 = sand.u32 1, %s616_s11   ;;  %s398_s27 = sshll.u32 %s624_s13, 3 }
  0x14   : > { %s397_s26 = sshll.u32 %s144_s25, 3  ;;  %s154_s30 = scalar_lea.hbm %s778_s0, %s398_s27 }
  0x15   : > { %s148_s3 = scalar_lea.vmem [#allocation3], %s397_s26  ;;  %s156_s5 = sshll.u32 %s154_s30, 4  ;;  %s157_s5 = int_to_ptr.hbm [resolvable:$true] %s156_s5 }
  0x16   : > { %s158_s4 = sshll.u32 %s148_s3, 4  ;;  %p416_p0 = pnand %p426_p13, %p686_p4  ;;  %s159_s4 = int_to_ptr.vmem [resolvable:$true] %s158_s4 }
  0x17   : > { %p401_p1 = scmp.ge.s32.totalorder %s628_s14, 1  ;;  %p184_p2 = scmp.lt.s32.totalorder %s628_s14, 3 }
  0x18   : > { %s145_s6 = scalar_lea.sflag [#allocation4], %s144_s25  ;;  %s175_s15 = scalar_lea.hbm %s779_s1, %s398_s27 }
  0x19   : > { %418 = dma.hbm_to_vmem [thread:$0]  (!%p416_p0), %s157_s5, 128, %s159_s4, %s145_s6  }
  0x1a   : > { %p185_p3 = pnand %p401_p1, %p184_p2  ;;  %s169_s16 = scalar_lea.vmem [#allocation6], %s397_s26 }
  0x1b   : > { %s179_s18 = sshll.u32 %s169_s16, 4  ;;  %s177_s20 = sshll.u32 %s175_s15, 4  ;;  %s180_s18 = int_to_ptr.vmem [resolvable:$true] %s179_s18  ;;  %s178_s20 = int_to_ptr.hbm [resolvable:$true] %s177_s20 }
  0x1c   : > { %s166_s28 = scalar_lea.sflag [#allocation7], %s144_s25  ;;  %188 = sbr.rel (%p185_p3) target bundleno = 78 (0x4e), region = 28 }
  0x1d   : > { %421 = dma.hbm_to_vmem [thread:$0]  (!%p416_p0), %s178_s20, 128, %s180_s18, %s166_s28  }
  0x1e   : > { %s722_s19 = sand.u32 (!%p185_p3), 1, %s612_s10  }
  0x1f   : > { %s725_s29 = sshll.u32 (!%p185_p3), %s722_s19, 3  ;;  %s191_s30 = scalar_lea.sflag (!%p185_p3), [#allocation4], %s722_s19 }
  0x20   : > { %s194_s3 = scalar_lea.vmem (!%p185_p3), [#allocation3], %s725_s29 }
  0x21   : > { %595 = dma.done.wait (%p692_p8), %s191_s30, 128  }
  0x22   : > { %597 = vsyncadd (%p692_p8), %s191_s30, 4294967168  ;;  %s201_s25 = scalar_lea.sflag [#allocation7], %s722_s19  ;;  %s204_s26 = scalar_lea.vmem [#allocation6], %s725_s29 }
  0x23   : > { %599 = dma.done.wait (%p692_p8), %s201_s25, 128  }
  0x24   : > { %601 = vsyncadd (%p692_p8), %s201_s25, 4294967168  ;;  %v240_v0 = vld [vmem:[%s194_s3] sm:$0xff]  ;;  %v241_v3 = vld [vmem:[%s204_s26] sm:$0xff]  ;;  %s406_s21 = sshll.u32 %s620_s12, 3  ;;  %s230_s6 = scalar_lea.vmem [#allocation8], %s725_s29 }
  0x25   : > { %476 = vlog2.f32 %v240_v0  ;;  %v245_v1 = vsub.f32 1.0, %v240_v0  ;;  %v250_v8 = vsub.f32 1.0, %v241_v3  ;;  %s280_s5 = scalar_lea.hbm %s780_s2, %s406_s21  ;;  %s282_s7 = sshll.u32 %s230_s6, 4  ;;  %s283_s7 = int_to_ptr.vmem [resolvable:$true] %s282_s7 }
  0x26   : > { %s284_s8 = sshll.u32 %s280_s5, 4  ;;  %s270_s15 = scalar_lea.sflag [#allocation5], %s722_s19  ;;  %s285_s8 = int_to_ptr.hbm [resolvable:$true] %s284_s8 }
  0x27   : > { %478 = vlog2.f32 %v245_v1  ;;  %s556_s16 = sshra.s32 %s285_s8, 4  ;;  %s562_s28 = scalar_lea.hbm %s780_s2, 16  ;;  %s557_s16 = int_to_ptr.hbm [resolvable:$true] %s556_s16 }
  0x28   : > { %s558_s12 = scalar_lea.hbm %s557_s16, 8  ;;  %p563_p7 = scmp.lt.s32.totalorder %s557_s16, %s780_s2 }
  0x29   : > { %p559_p4 = scmp.ne.s32.totalorder %s557_s16, %s558_s12  ;;  %p564_p8 = scmp.lt.s32.totalorder %s562_s28, %s558_s12 }
  0x2b   : > { %v477_v2 = vpop.eup %476  ;;  %p560_p5 = pnand %p559_p4, %p696_p9  ;;  %p565_p10 = por %p564_p8, %p563_p7 }
  0x2c   : > { %v243_v4 = vmul.f32 0.6931472, %v477_v2 }
  0x2d   : > { %v479_v5 = vpop.eup %478  ;;  %p561_p6 = pneg %p560_p5 }
  0x2e   : > { %v244_v6 = vmax.f32 %v243_v4, -100.0  ;;  %v247_v7 = vmul.f32 0.6931472, %v479_v5 }
  0x2f   : > { %p566_p13 = pnand %p565_p10, %p561_p6 }
  0x30   : > { %v248_v9 = vmax.f32 %v247_v7, -100.0  ;;  %v249_v10 = vmul.f32 %v244_v6, %v241_v3 }
  0x32   : > { %v251_v11 = vmul.f32 %v250_v8, %v248_v9 }
  0x34   : > { %v252_v12 = vadd.f32 %v251_v11, %v249_v10 }
  0x36   : > { %v253_v13 = vsub.f32 0.0, %v252_v12 }
  0x38   : > { %v254_v14 = vsub.f32 0.0, %v253_v13 }
  0x3a   : > { %v255_v15 = vmul.f32 1.442695, %v254_v14 }
  0x3c   : > { %480 = vpow2.f32 %v255_v15 }
  0x42   : > { %v481_v16 = vpop.eup %480 }
  0x43   : > { %v257_v17 = vsub.f32 1.0, %v481_v16 }
  0x45   : > { %v258_v18 = vmul.f32 %v257_v17, %v257_v17 }
  0x47   : > { %v259_v19 = vmul.f32 0.5, %v258_v18 }
  0x49   : > { %v260_v20 = vmul.f32 %v259_v19, %v253_v13 }
  0x4b   : > { %268 = vst [vmem:[%s230_s6] sm:$0xff] %v260_v20 }
  0x4c   : > { %569 = shalt.err (!%p566_p13)
}
  0x4d   : > { %413 = dma.vmem_to_hbm [thread:$0]  (%p696_p9), %s283_s7, 128, %s285_s8, %s270_s15  }
  0x4e PF: > { %s296_s19 = sand.u32 1, %s608_s9   ;;  %p423_p0 = pnand %p396_p12, %p703_p11 }
  0x4f   : > { %s297_s3 = scalar_lea.sflag [#allocation5], %s296_s19 }
  0x50   : > { %p424_p1 = pneg %p423_p0 }
  0x52   : > { %603 = dma.done.wait (%p424_p1), %s297_s3, 128  }
  0x53   : > { %605 = vsyncadd (%p424_p1), %s297_s3, 4294967168  ;;  %s21_s14 = sadd.s32 1, %s628_s14   ;;  %s785_s9 = smov %s612_s10 }
  0x54   : > { %p18_p2 = scmp.ge.s32.totalorder %s21_s14, 4   ;;  %s786_s10 = smov %s616_s11 }
  0x55   : > { %s787_s11 = smov %s701_s23  ;;  %s788_s12 = smov %s624_s13 }
  0x56   : > { %s789_s13 = smov %s791_s17  ;;  %20 = sbr.rel (!%p18_p2) target bundleno = 8 (0x8), region = 94 }
  0x5b   :  { %303 = vsyncpa [#allocation4], 1 }
  0x5c   :  { %305 = vsyncpa [#allocation4 + $0x1], 1 }
  0x5d   :  { %306 = vsyncpa [#allocation7], 1 }
  0x5e   :  { %308 = vsyncpa [#allocation7 + $0x1], 1 }
  0x5f   :  { %309 = vsyncpa [#allocation5], 1 }
  0x60   :  { %311 = vsyncpa [#allocation5 + $0x1], 1 }

</bundles_post_ra>
